<compile_context>
chip_gen: v6e
topology: v6e:2x2x1
jax: 0.10.0
libtpu: 0.0.40
codegen_flags: <defaults>
</compile_context>

<pallas_src>
import jax
import jax.numpy as jnp
from jax.experimental import pallas as pl
from jax.experimental.pallas import tpu as pltpu

OUT_PAD = 128  # lane-dense width for the final (hidden -> 1) layer


def _round_up(x, m):
    return (x + m - 1) // m * m


def softq_kernel(s_ref, a_ref, w1s_ref, w1a_ref, b1_ref,
                 w2_ref, b2_ref, w3_ref, b3_ref, w4_ref, b4_ref, out_ref):
    # Layer 1: concat folded into two matmuls (state part + action part).
    h = (jnp.dot(s_ref[...], w1s_ref[...], preferred_element_type=jnp.float32)
         + jnp.dot(a_ref[...], w1a_ref[...], preferred_element_type=jnp.float32)
         + b1_ref[...])
    h = jnp.maximum(h, 0.0)
    # Layer 2
    h = jnp.dot(h, w2_ref[...], preferred_element_type=jnp.float32) + b2_ref[...]
    h = jnp.maximum(h, 0.0)
    # Layer 3
    h = jnp.dot(h, w3_ref[...], preferred_element_type=jnp.float32) + b3_ref[...]
    h = jnp.maximum(h, 0.0)
    # Layer 4: (hidden -> OUT_PAD) where only column 0 is the real Q value.
    q = jnp.dot(h, w4_ref[...], preferred_element_type=jnp.float32) + b4_ref[...]
    out_ref[...] = q.astype(out_ref.dtype)


def soft_q_forward(state, action, params, *, block_b=512):
    """state: (B, num_inputs), action: (B, num_actions) -> (B, 1)."""
    w1, b1, w2, b2, w3, b3, w4, b4 = params
    B, num_inputs = state.shape
    num_actions = action.shape[1]
    hidden = w1.shape[1]

    # Split first-layer weight: rows [0:num_inputs] multiply state, the rest action.
    w1s = w1[:num_inputs, :]
    w1a = w1[num_inputs:, :]

    # Lane-dense final layer: zero-pad N=1 -> OUT_PAD.
    w4p = jnp.zeros((hidden, OUT_PAD), w4.dtype).at[:, :1].set(w4)
    b4p = jnp.zeros((1, OUT_PAD), b4.dtype).at[:, :1].set(b4)

    # Batch tiling: tile is 8-aligned and padded batch is a multiple of the tile.
    tb = min(block_b, _round_up(B, 8))
    b_pad = _round_up(B, tb)
    if b_pad != B:
        state = jnp.pad(state, ((0, b_pad - B), (0, 0)))
        action = jnp.pad(action, ((0, b_pad - B), (0, 0)))

    grid = (b_pad // tb,)

    def row_spec(cols):
        return pl.BlockSpec((tb, cols), lambda i: (i, 0))

    def resident_spec(shape):
        # Weights/biases: same block every grid step -> stays VMEM-resident.
        return pl.BlockSpec(shape, lambda i: (0, 0))

    out = pl.pallas_call(
        softq_kernel,
        out_shape=jax.ShapeDtypeStruct((b_pad, OUT_PAD), jnp.float32),
        grid=grid,
        in_specs=[
            row_spec(num_inputs),                  # state tile
            row_spec(num_actions),                 # action tile
            resident_spec((num_inputs, hidden)),   # w1_state
            resident_spec((num_actions, hidden)),  # w1_action
            resident_spec((1, hidden)),            # b1
            resident_spec((hidden, hidden)),       # w2
            resident_spec((1, hidden)),            # b2
            resident_spec((hidden, hidden)),       # w3
            resident_spec((1, hidden)),            # b3
            resident_spec((hidden, OUT_PAD)),      # w4 (padded)
            resident_spec((1, OUT_PAD)),           # b4 (padded)
        ],
        out_specs=row_spec(OUT_PAD),
        compiler_params=pltpu.CompilerParams(
            dimension_semantics=("parallel",),
        ),
    )(state, action, w1s, w1a, b1, w2, b2, w3, b3, w4p, b4p)

    return out[:B, :1]


def init_params(key, num_inputs, num_actions, hidden_size, init_w=0.003):
    """Mirrors PyTorch nn.Linear defaults + uniform(-init_w, init_w) on the last
    layer. Weights are stored as (in, out)."""
    keys = jax.random.split(key, 8)

    def linear_default(kw, kb, fan_in, fan_out):
        bound = 1.0 / jnp.sqrt(jnp.float32(fan_in))
        w = jax.random.uniform(kw, (fan_in, fan_out), jnp.float32, -bound, bound)
        b = jax.random.uniform(kb, (1, fan_out), jnp.float32, -bound, bound)
        return w, b

    in_dim = num_inputs + num_actions
    w1, b1 = linear_default(keys[0], keys[1], in_dim, hidden_size)
    w2, b2 = linear_default(keys[2], keys[3], hidden_size, hidden_size)
    w3, b3 = linear_default(keys[4], keys[5], hidden_size, hidden_size)
    w4 = jax.random.uniform(keys[6], (hidden_size, 1), jnp.float32, -init_w, init_w)
    b4 = jax.random.uniform(keys[7], (1, 1), jnp.float32, -init_w, init_w)
    return (w1, b1, w2, b2, w3, b3, w4, b4)


def soft_q_ref(state, action, params):
    w1, b1, w2, b2, w3, b3, w4, b4 = params
    x = jnp.concatenate([state, action], axis=1)
    x = jax.nn.relu(x @ w1 + b1)
    x = jax.nn.relu(x @ w2 + b2)
    x = jax.nn.relu(x @ w3 + b3)
    return x @ w4 + b4


if __name__ == "__main__":
    key = jax.random.PRNGKey(0)
    k_param, k_state, k_action = jax.random.split(key, 3)

    batch = 4
    num_inputs = 16
    num_actions = 4
    hidden_size = 32

    params = init_params(k_param, num_inputs, num_actions, hidden_size)
    state = jax.random.normal(k_state, (batch, num_inputs), jnp.float32)
    action = jax.random.normal(k_action, (batch, num_actions), jnp.float32)

    q = soft_q_forward(state, action, params)
    q = jax.block_until_ready(q)

    q_ref = soft_q_ref(state, action, params)
    assert q.shape == (batch, 1)
    assert jnp.allclose(q, q_ref, atol=1e-5, rtol=1e-5)

    print("KERNEL_OK")
</pallas_src>

<mosaic_0001>
module attributes {stable_mosaic.version = 11 : i64} {
  func.func @softq_kernel(%arg0: i32, %arg1: memref<8x16xf32, #tpu.memory_space<vmem>>, %arg2: memref<8x4xf32, #tpu.memory_space<vmem>>, %arg3: memref<16x32xf32, #tpu.memory_space<vmem>>, %arg4: memref<4x32xf32, #tpu.memory_space<vmem>>, %arg5: memref<1x32xf32, #tpu.memory_space<vmem>>, %arg6: memref<32x32xf32, #tpu.memory_space<vmem>>, %arg7: memref<1x32xf32, #tpu.memory_space<vmem>>, %arg8: memref<32x32xf32, #tpu.memory_space<vmem>>, %arg9: memref<1x32xf32, #tpu.memory_space<vmem>>, %arg10: memref<32x128xf32, #tpu.memory_space<vmem>>, %arg11: memref<1x128xf32, #tpu.memory_space<vmem>>, %arg12: memref<8x128xf32, #tpu.memory_space<vmem>>) attributes {dimension_semantics = [#tpu.dimension_semantics<parallel>], iteration_bounds = array<i64: 1>, scalar_prefetch = 0 : i64, scratch_operands = 0 : i64, tpu.core_type = #tpu.core_type<tc>, window_params = [{transform_indices = @transform_0, window_bounds = array<i64: 8, 16>}, {transform_indices = @transform_1, window_bounds = array<i64: 8, 4>}, {pipeline_mode = #tpu.pipeline_mode<synchronous>, transform_indices = @transform_2, window_bounds = array<i64: 16, 32>}, {pipeline_mode = #tpu.pipeline_mode<synchronous>, transform_indices = @transform_3, window_bounds = array<i64: 4, 32>}, {pipeline_mode = #tpu.pipeline_mode<synchronous>, transform_indices = @transform_4, window_bounds = array<i64: 1, 32>}, {pipeline_mode = #tpu.pipeline_mode<synchronous>, transform_indices = @transform_5, window_bounds = array<i64: 32, 32>}, {pipeline_mode = #tpu.pipeline_mode<synchronous>, transform_indices = @transform_6, window_bounds = array<i64: 1, 32>}, {pipeline_mode = #tpu.pipeline_mode<synchronous>, transform_indices = @transform_7, window_bounds = array<i64: 32, 32>}, {pipeline_mode = #tpu.pipeline_mode<synchronous>, transform_indices = @transform_8, window_bounds = array<i64: 1, 32>}, {pipeline_mode = #tpu.pipeline_mode<synchronous>, transform_indices = @transform_9, window_bounds = array<i64: 32, 128>}, {pipeline_mode = #tpu.pipeline_mode<synchronous>, transform_indices = @transform_10, window_bounds = array<i64: 1, 128>}, {transform_indices = @transform_11, window_bounds = array<i64: 8, 128>}]} {
    %c0 = arith.constant 0 : index
    %c0_0 = arith.constant 0 : index
    %0 = vector.load %arg1[%c0, %c0_0] : memref<8x16xf32, #tpu.memory_space<vmem>>, vector<8x16xf32>
    %c0_1 = arith.constant 0 : index
    %c0_2 = arith.constant 0 : index
    %1 = vector.load %arg3[%c0_1, %c0_2] : memref<16x32xf32, #tpu.memory_space<vmem>>, vector<16x32xf32>
    %cst = arith.constant dense<0.000000e+00> : vector<8x32xf32>
    %2 = tpu.matmul %0, %1, %cst {dimension_numbers = #tpu.dot_dimension_numbers<[1], [0], [0], [1], [0, 0, 1, 1], [], []>} : vector<8x16xf32>, vector<16x32xf32>, vector<8x32xf32> -> vector<8x32xf32>
    %c0_3 = arith.constant 0 : index
    %c0_4 = arith.constant 0 : index
    %3 = vector.load %arg2[%c0_3, %c0_4] : memref<8x4xf32, #tpu.memory_space<vmem>>, vector<8x4xf32>
    %c0_5 = arith.constant 0 : index
    %c0_6 = arith.constant 0 : index
    %4 = vector.load %arg4[%c0_5, %c0_6] : memref<4x32xf32, #tpu.memory_space<vmem>>, vector<4x32xf32>
    %cst_7 = arith.constant dense<0.000000e+00> : vector<8x32xf32>
    %5 = tpu.matmul %3, %4, %cst_7 {dimension_numbers = #tpu.dot_dimension_numbers<[1], [0], [0], [1], [0, 0, 1, 1], [], []>} : vector<8x4xf32>, vector<4x32xf32>, vector<8x32xf32> -> vector<8x32xf32>
    %6 = arith.addf %2, %5 : vector<8x32xf32>
    %c0_8 = arith.constant 0 : index
    %c0_9 = arith.constant 0 : index
    %7 = vector.load %arg5[%c0_8, %c0_9] : memref<1x32xf32, #tpu.memory_space<vmem>>, vector<1x32xf32>
    %8 = vector.broadcast %7 : vector<1x32xf32> to vector<8x32xf32>
    %9 = arith.addf %6, %8 : vector<8x32xf32>
    %cst_10 = arith.constant 0.000000e+00 : f32
    %10 = vector.broadcast %cst_10 : f32 to vector<8x32xf32>
    %11 = arith.maximumf %9, %10 : vector<8x32xf32>
    %c0_11 = arith.constant 0 : index
    %c0_12 = arith.constant 0 : index
    %12 = vector.load %arg6[%c0_11, %c0_12] : memref<32x32xf32, #tpu.memory_space<vmem>>, vector<32x32xf32>
    %cst_13 = arith.constant dense<0.000000e+00> : vector<8x32xf32>
    %13 = tpu.matmul %11, %12, %cst_13 {dimension_numbers = #tpu.dot_dimension_numbers<[1], [0], [0], [1], [0, 0, 1, 1], [], []>} : vector<8x32xf32>, vector<32x32xf32>, vector<8x32xf32> -> vector<8x32xf32>
    %c0_14 = arith.constant 0 : index
    %c0_15 = arith.constant 0 : index
    %14 = vector.load %arg7[%c0_14, %c0_15] : memref<1x32xf32, #tpu.memory_space<vmem>>, vector<1x32xf32>
    %15 = vector.broadcast %14 : vector<1x32xf32> to vector<8x32xf32>
    %16 = arith.addf %13, %15 : vector<8x32xf32>
    %cst_16 = arith.constant 0.000000e+00 : f32
    %17 = vector.broadcast %cst_16 : f32 to vector<8x32xf32>
    %18 = arith.maximumf %16, %17 : vector<8x32xf32>
    %c0_17 = arith.constant 0 : index
    %c0_18 = arith.constant 0 : index
    %19 = vector.load %arg8[%c0_17, %c0_18] : memref<32x32xf32, #tpu.memory_space<vmem>>, vector<32x32xf32>
    %cst_19 = arith.constant dense<0.000000e+00> : vector<8x32xf32>
    %20 = tpu.matmul %18, %19, %cst_19 {dimension_numbers = #tpu.dot_dimension_numbers<[1], [0], [0], [1], [0, 0, 1, 1], [], []>} : vector<8x32xf32>, vector<32x32xf32>, vector<8x32xf32> -> vector<8x32xf32>
    %c0_20 = arith.constant 0 : index
    %c0_21 = arith.constant 0 : index
    %21 = vector.load %arg9[%c0_20, %c0_21] : memref<1x32xf32, #tpu.memory_space<vmem>>, vector<1x32xf32>
    %22 = vector.broadcast %21 : vector<1x32xf32> to vector<8x32xf32>
    %23 = arith.addf %20, %22 : vector<8x32xf32>
    %cst_22 = arith.constant 0.000000e+00 : f32
    %24 = vector.broadcast %cst_22 : f32 to vector<8x32xf32>
    %25 = arith.maximumf %23, %24 : vector<8x32xf32>
    %c0_23 = arith.constant 0 : index
    %c0_24 = arith.constant 0 : index
    %26 = vector.load %arg10[%c0_23, %c0_24] : memref<32x128xf32, #tpu.memory_space<vmem>>, vector<32x128xf32>
    %cst_25 = arith.constant dense<0.000000e+00> : vector<8x128xf32>
    %27 = tpu.matmul %25, %26, %cst_25 {dimension_numbers = #tpu.dot_dimension_numbers<[1], [0], [0], [1], [0, 0, 1, 1], [], []>} : vector<8x32xf32>, vector<32x128xf32>, vector<8x128xf32> -> vector<8x128xf32>
    %c0_26 = arith.constant 0 : index
    %c0_27 = arith.constant 0 : index
    %28 = vector.load %arg11[%c0_26, %c0_27] : memref<1x128xf32, #tpu.memory_space<vmem>>, vector<1x128xf32>
    %29 = vector.broadcast %28 : vector<1x128xf32> to vector<8x128xf32>
    %30 = arith.addf %27, %29 : vector<8x128xf32>
    %c0_28 = arith.constant 0 : index
    %c0_29 = arith.constant 0 : index
    %31 = vector.load %arg12[%c0_28, %c0_29] : memref<8x128xf32, #tpu.memory_space<vmem>>, vector<8x128xf32>
    tpu.vector_store %arg12[%c0_28, %c0_29], %30 {strides = array<i32>} : memref<8x128xf32, #tpu.memory_space<vmem>>, vector<8x128xf32>,
    return
  }
  func.func @transform_0(%arg0: i32) -> (i32, i32) {
    %c0_i32 = arith.constant 0 : i32
    %c0_i32_0 = arith.constant 0 : i32
    return %arg0, %c0_i32 : i32, i32
  }
  func.func @transform_1(%arg0: i32) -> (i32, i32) {
    %c0_i32 = arith.constant 0 : i32
    %c0_i32_0 = arith.constant 0 : i32
    return %arg0, %c0_i32 : i32, i32
  }
  func.func @transform_2(%arg0: i32) -> (i32, i32) {
    %c0_i32 = arith.constant 0 : i32
    %c0_i32_0 = arith.constant 0 : i32
    %c0_i32_1 = arith.constant 0 : i32
    return %c0_i32, %c0_i32_0 : i32, i32
  }
  func.func @transform_3(%arg0: i32) -> (i32, i32) {
    %c0_i32 = arith.constant 0 : i32
    %c0_i32_0 = arith.constant 0 : i32
    %c0_i32_1 = arith.constant 0 : i32
    return %c0_i32, %c0_i32_0 : i32, i32
  }
  func.func @transform_4(%arg0: i32) -> (i32, i32) {
    %c0_i32 = arith.constant 0 : i32
    %c0_i32_0 = arith.constant 0 : i32
    %c0_i32_1 = arith.constant 0 : i32
    return %c0_i32, %c0_i32_0 : i32, i32
  }
  func.func @transform_5(%arg0: i32) -> (i32, i32) {
    %c0_i32 = arith.constant 0 : i32
    %c0_i32_0 = arith.constant 0 : i32
    %c0_i32_1 = arith.constant 0 : i32
    return %c0_i32, %c0_i32_0 : i32, i32
  }
  func.func @transform_6(%arg0: i32) -> (i32, i32) {
    %c0_i32 = arith.constant 0 : i32
    %c0_i32_0 = arith.constant 0 : i32
    %c0_i32_1 = arith.constant 0 : i32
    return %c0_i32, %c0_i32_0 : i32, i32
  }
  func.func @transform_7(%arg0: i32) -> (i32, i32) {
    %c0_i32 = arith.constant 0 : i32
    %c0_i32_0 = arith.constant 0 : i32
    %c0_i32_1 = arith.constant 0 : i32
    return %c0_i32, %c0_i32_0 : i32, i32
  }
  func.func @transform_8(%arg0: i32) -> (i32, i32) {
    %c0_i32 = arith.constant 0 : i32
    %c0_i32_0 = arith.constant 0 : i32
    %c0_i32_1 = arith.constant 0 : i32
    return %c0_i32, %c0_i32_0 : i32, i32
  }
  func.func @transform_9(%arg0: i32) -> (i32, i32) {
    %c0_i32 = arith.constant 0 : i32
    %c0_i32_0 = arith.constant 0 : i32
    %c0_i32_1 = arith.constant 0 : i32
    return %c0_i32, %c0_i32_0 : i32, i32
  }
  func.func @transform_10(%arg0: i32) -> (i32, i32) {
    %c0_i32 = arith.constant 0 : i32
    %c0_i32_0 = arith.constant 0 : i32
    %c0_i32_1 = arith.constant 0 : i32
    return %c0_i32, %c0_i32_0 : i32, i32
  }
  func.func @transform_11(%arg0: i32) -> (i32, i32) {
    %c0_i32 = arith.constant 0 : i32
    %c0_i32_0 = arith.constant 0 : i32
    return %arg0, %c0_i32 : i32, i32
  }
}

</mosaic_0001>

<bundles_post_ra>
// kernel: tpu_custom_call.1
= control target key start
LH: loop header
LB: loop body
LE: loop exit
PB: predicated region body
PF: predicated region fallthrough
CT: control target
= control target key end

     0   :  { %16 = vsyncpa [#allocation3], 0  ;;  %s870_s0 = inlined_call_operand.vmem [shape: f32[8,16], index: 0, kind: input, shape index: {}]   ;;  %s871_s1 = inlined_call_operand.vmem [shape: f32[8,4], index: 1, kind: input, shape index: {}]   ;;  %s872_s2 = inlined_call_operand.hbm [shape: f32[16,32], index: 2, kind: input, shape index: {}]   ;;  %s873_s3 = inlined_call_operand.vmem [shape: f32[4,32], index: 3, kind: input, shape index: {}]   ;;  %s874_s4 = inlined_call_operand.vmem [shape: f32[1,32], index: 4, kind: input, shape index: {}]   ;;  %s875_s5 = inlined_call_operand.hbm [shape: f32[32,32], index: 5, kind: input, shape index: {}]   ;;  %s876_s6 = inlined_call_operand.vmem [shape: f32[1,32], index: 6, kind: input, shape index: {}]   ;;  %s877_s7 = inlined_call_operand.hbm [shape: f32[32,32], index: 7, kind: input, shape index: {}]   ;;  %s878_s8 = inlined_call_operand.vmem [shape: f32[1,32], index: 8, kind: input, shape index: {}]   ;;  %s879_s9 = inlined_call_operand.hbm [shape: f32[32,128], index: 9, kind: input, shape index: {}]   ;;  %s880_s10 = inlined_call_operand.vmem [shape: f32[1,128], index: 10, kind: input, shape index: {}]   ;;  %s881_s11 = inlined_call_operand.hbm [shape: f32[8,128], index: 11, kind: output, shape index: {}]  }
   0x1   :  { %17 = vsyncpa [#allocation6], 0 }
   0x2   :  { %18 = vsyncpa [#allocation9], 0 }
   0x3   :  { %19 = vsyncpa [#allocation4], 0  ;;  %s725_s17 = smov [#allocation5]   ;;  %s726_s19 = smov [#allocation2]  }
   0x4   :  { %s45_s18 = sshll.u32 %s725_s17, 4  ;;  %s29_s20 = sshll.u32 %s726_s19, 4  ;;  %s46_s18 = int_to_ptr.vmem [resolvable:$true] %s45_s18  ;;  %s30_s20 = int_to_ptr.vmem [resolvable:$true] %s29_s20 }
   0x5   :  { %s625_s21 = scalar_lea.vmem %s46_s18, 512  ;;  %p630_p1 = scmp.lt.s32.totalorder %s46_s18, %s46_s18 }
   0x6   :  { %p626_p0 = scmp.ne.s32.totalorder %s46_s18, %s625_s21  ;;  %p631_p2 = scmp.lt.s32.totalorder %s625_s21, %s625_s21 }
   0x8   :  { %p632_p3 = por %p631_p2, %p630_p1 }
   0xa   :  { %p633_p4 = pnand %p632_p3, %p626_p0 }
   0xc   :  { %636 = shalt.err (!%p633_p4)
}
   0xd   :  { %s727_s22 = smov 128   ;;  %s728_s23 = smov 8  }
   0xe   :  { %51 = dma.hbm_to_vmem [thread:$0]  %s875_s5, 512, %s46_s18, [#allocation6], %s727_s22, %s727_s22, %s728_s23  }
   0xf   :  { %s645_s26 = scalar_lea.vmem %s30_s20, 256  ;;  %p650_p6 = scmp.lt.s32.totalorder %s30_s20, %s30_s20 }
  0x10   :  { %p646_p5 = scmp.ne.s32.totalorder %s30_s20, %s645_s26  ;;  %p651_p7 = scmp.lt.s32.totalorder %s645_s26, %s645_s26 }
  0x12   :  { %p652_p8 = por %p651_p7, %p650_p6 }
  0x14   :  { %p653_p9 = pnand %p652_p8, %p646_p5 }
  0x16   :  { %656 = shalt.err (!%p653_p9)
}
  0x17   :  { %35 = dma.hbm_to_vmem [thread:$0]  %s872_s2, 256, %s30_s20, [#allocation3], %s727_s22, %s727_s22, %s728_s23  }
  0x18   :  { %s729_s29 = smov [#allocation7]   ;;  %s730_s12 = smov [#allocation8]  }
  0x19   :  { %s59_s30 = sshll.u32 %s729_s29, 4  ;;  %s73_s13 = sshll.u32 %s730_s12, 4  ;;  %s60_s30 = int_to_ptr.vmem [resolvable:$true] %s59_s30  ;;  %s74_s13 = int_to_ptr.vmem [resolvable:$true] %s73_s13 }
  0x1a   :  { %s665_s5 = scalar_lea.vmem %s60_s30, 512  ;;  %p670_p11 = scmp.lt.s32.totalorder %s60_s30, %s60_s30 }
  0x1b   :  { %p666_p10 = scmp.ne.s32.totalorder %s60_s30, %s665_s5  ;;  %p671_p12 = scmp.lt.s32.totalorder %s665_s5, %s665_s5 }
  0x1d   :  { %p672_p13 = por %p671_p12, %p670_p11 }
  0x1f   :  { %p673_p0 = pnand %p672_p13, %p666_p10 }
  0x21   :  { %676 = shalt.err (!%p673_p0)
}
  0x22   :  { %65 = dma.hbm_to_vmem [thread:$0]  %s877_s7, 512, %s60_s30, [#allocation6], %s727_s22, %s727_s22, %s728_s23  }
  0x23   :  { %s685_s2 = scalar_lea.vmem %s74_s13, 512  ;;  %p690_p2 = scmp.lt.s32.totalorder %s74_s13, %s74_s13 }
  0x24   :  { %p686_p1 = scmp.ne.s32.totalorder %s74_s13, %s685_s2  ;;  %p691_p3 = scmp.lt.s32.totalorder %s685_s2, %s685_s2 }
  0x26   :  { %p692_p4 = por %p691_p3, %p690_p2 }
  0x28   :  { %p693_p5 = pnand %p692_p4, %p686_p1 }
  0x2a   :  { %696 = shalt.err (!%p693_p5)
}
  0x2b   :  { %79 = dma.hbm_to_vmem [thread:$0]  %s879_s9, 512, %s74_s13, [#allocation9], %s727_s22, %s727_s22, %s728_s23  }
  0x2c   :  { %717 = dma.done.wait [#allocation3], 256  }
  0x2d   :  { %718 = vsyncadd [#allocation3], 4294967040 }
  0x2e   :  { %719 = dma.done.wait [#allocation6], 1024  }
  0x2f   :  { %720 = vsyncadd [#allocation6], 4294966272 }
  0x30   :  { %721 = dma.done.wait [#allocation9], 512  }
  0x31   :  { %722 = vsyncadd [#allocation9], 4294966784  ;;  %v731_v0 = vmov 0.0   ;;  %vm732_vm0 = vmmov 0   ;;  %vm103_vm1 = vcmask 1043456   ;;  %vm99_vm2 = vcmask 31744  }
  0x32   :  { %563 = vmatprep.subr.mxu1 %v731_v0  ;;  %565 = vmatprep.mubr.msk.f32.mxu1 %vm732_vm0, %v731_v0  ;;  %v98_v1 = vld [vmem:[%s873_s3] sm:$0xf]  ;;  %v96_v3 = vld [vmem:[#allocation2 + $0x8] sm:$0xff]  ;;  %vm177_vm3 = vcmask 130048   ;;  %v261_v8 = vld [vmem:[#allocation5 + $0x8] sm:$0xff]  ;;  %vm271_vm4 = vcmask 261120  }
  0x33   :  { %575 = vmatprep.subr.mxu0 %v731_v0  ;;  %583 = vmatprep.mubr.msk.f32.mxu0 %vm732_vm0, %v731_v0  ;;  %v97_v2 = vld [vmem:[%s871_s1] sm:$0xff]  ;;  %v263_v6 = vld [vmem:[#allocation5 + $0x18] sm:$0xff]  ;;  %v260_v9 = vld [vmem:[#allocation5] sm:$0xff]  ;;  %s733_s25 = smov [#allocation10]  }
  0x34   :  { %564 = vmatpush3.msk.msra.mxu1 %vm103_vm1, %v98_v1  ;;  %v95_v4 = vld [vmem:[#allocation2] sm:$0xff]  ;;  %576 = vmatpush3.msra.mxu0 %v263_v6  ;;  %v349_v10 = vld [vmem:[#allocation7 + $0x18] sm:$0xff]  ;;  %v347_v20 = vld [vmem:[#allocation7 + $0x8] sm:$0xff]  ;;  %s522_s26 = sshll.u32 %s733_s25, 4  ;;  %s523_s26 = int_to_ptr.vmem [resolvable:$true] %s522_s26 }
  0x35   :  { %566 = vmatmul.mubr.msk.f32.vlgmr.msra.gmra.mxu1 %vm99_vm2, %v97_v2  ;;  %568 = vmatprep.subr.mxu1 %v731_v0  ;;  %v94_v5 = vld [vmem:[%s870_s0] sm:$0xff]  ;;  %v346_v21 = vld [vmem:[#allocation7] sm:$0xff]  ;;  %v434_v22 = vld [vmem:[#allocation8 + $0x18] sm:$0xff]  ;;  %s697_s27 = scalar_lea.vmem %s523_s26, 128  ;;  %p702_p7 = scmp.lt.s32.totalorder %s523_s26, %s523_s26 }
  0x36   :  { %569 = vmatpush3.msra.mxu1 %v96_v3  ;;  %572 = vmatprep.mubr.msk.f32.mxu1 %vm732_vm0, %v731_v0  ;;  %v262_v7 = vld [vmem:[#allocation5 + $0x10] sm:$0xff]  ;;  %v432_v29 = vld [vmem:[#allocation8 + $0x8] sm:$0xff]  ;;  %v431_v30 = vld [vmem:[#allocation8] sm:$0xff]  ;;  %p698_p6 = scmp.ne.s32.totalorder %s523_s26, %s697_s27  ;;  %p703_p8 = scmp.lt.s32.totalorder %s697_s27, %s697_s27 }
  0x37   :  { %570 = vmatprep.subr.mxu1 %v731_v0  ;;  %577 = vmatprep.subr.mxu0 %v731_v0  ;;  %v536_v14 = vld [vmem:[%s874_s4] ss:$0 sm:$0xff] }
  0x38   :  { %571 = vmatpush3.msra.mxu1 %v95_v4  ;;  %578 = vmatpush3.msra.mxu0 %v262_v7  ;;  %v348_v19 = vld [vmem:[#allocation7 + $0x10] sm:$0xff]  ;;  %p704_p9 = por %p703_p8, %p702_p7 }
  0x39   :  { %573 = vmatmul.mubr.msk.f32.vlgmr.msra.gmra.mxu1 %vm177_vm3, %v94_v5  ;;  %586 = vmatprep.subr.mxu1 %v731_v0  ;;  %v537_v23 = vld [vmem:[%s876_s6] ss:$0 sm:$0xff] }
  0x3a   :  { %594 = vmatprep.mubr.msk.f32.mxu1 %vm732_vm0, %v731_v0  ;;  %579 = vmatprep.subr.mxu0 %v731_v0  ;;  %v433_v28 = vld [vmem:[#allocation8 + $0x10] sm:$0xff]  ;;  %p705_p10 = pnand %p704_p9, %p698_p6 }
  0x3b   :  { %580 = vmatpush3.msra.mxu0 %v261_v8  ;;  %587 = vmatpush3.msra.mxu1 %v349_v10  ;;  %v539_v31 = vld [vmem:[%s878_s8] ss:$0 sm:$0xff] }
  0x3c   :  { %581 = vmatprep.subr.mxu0 %v731_v0  ;;  %588 = vmatprep.subr.mxu1 %v731_v0  ;;  %v541_v36 = vld [vmem:[%s880_s10] ss:$0 sm:$0xff] }
  0x3d   :  { %582 = vmatpush3.msra.mxu0 %v260_v9  ;;  %589 = vmatpush3.msra.mxu1 %v348_v19 }
  0x3e   :  { %597 = vmatprep.subr.mxu0 %v731_v0  ;;  %590 = vmatprep.subr.mxu1 %v731_v0 }
  0x3f   :  { %591 = vmatpush3.msra.mxu1 %v347_v20 }
  0x40   :  { %592 = vmatprep.subr.mxu1 %v731_v0 }
  0x41   :  { %593 = vmatpush3.msra.mxu1 %v346_v21 }
  0xf5   :  { %v173_v11 = vpop.f32.mrf.mxu1 }
  0xf7   :  { %v567_v12 = vpop.f32.mrf.mxu1 }
  0xf9   :  { %v247_v13 = vpop.f32.mrf.mxu1 }
  0xfa   :  { %v248_v15 = vadd.f32 %v247_v13, %v173_v11 }
  0xfb   :  { %v574_v16 = vpop.f32.mrf.mxu1 }
  0xfc   :  { %v258_v17 = vadd.f32 %v536_v14, %v248_v15 }
  0xfe   :  { %v259_v18 = vmax.f32 %v258_v17, 0.0 }
 0x100   :  { %584 = vmatmul.mubr.msk.f32.vlgmr.msra.gmra.mxu0 %vm271_vm4, %v259_v18 }
 0x101   :  { %605 = vmatprep.mubr.msk.f32.mxu0 %vm732_vm0, %v731_v0  ;;  %598 = vmatpush3.msra.mxu0 %v434_v22 }
 0x102   :  { %599 = vmatprep.subr.mxu0 %v731_v0 }
 0x103   :  { %600 = vmatpush3.msra.mxu0 %v433_v28 }
 0x104   :  { %601 = vmatprep.subr.mxu0 %v731_v0 }
 0x105   :  { %602 = vmatpush3.msra.mxu0 %v432_v29 }
 0x106   :  { %603 = vmatprep.subr.mxu0 %v731_v0 }
 0x107   :  { %604 = vmatpush3.msra.mxu0 %v431_v30 }
 0x1c0   :  { %v341_v24 = vpop.f32.mrf.mxu0 }
 0x1c1   :  { %v342_v25 = vadd.f32 %v537_v23, %v341_v24 }
 0x1c2   :  { %v585_v26 = vpop.f32.mrf.mxu0 }
 0x1c3   :  { %v345_v27 = vmax.f32 %v342_v25, 0.0 }
 0x1c5   :  { %595 = vmatmul.mubr.msk.f32.vlgmr.msra.gmra.mxu1 %vm271_vm4, %v345_v27 }
 0x285   :  { %v426_v32 = vpop.f32.mrf.mxu1 }
 0x286   :  { %v427_v33 = vadd.f32 %v539_v31, %v426_v32 }
 0x287   :  { %v596_v34 = vpop.f32.mrf.mxu1 }
 0x288   :  { %v430_v35 = vmax.f32 %v427_v33, 0.0 }
 0x28a   :  { %606 = vmatmul.mubr.msk.f32.vlgmr.msra.gmra.mxu0 %vm271_vm4, %v430_v35 }
 0x34a   :  { %v511_v37 = vpop.f32.mrf.mxu0 }
 0x34b   :  { %v512_v38 = vadd.f32 %v541_v36, %v511_v37 }
 0x34c   :  { %v607_v39 = vpop.f32.mrf.mxu0 }
 0x34d   :  { %515 = vst [vmem:[#allocation10] sm:$0xff] %v512_v38 }
 0x34e   :  { %708 = shalt.err (!%p705_p10)
}
 0x34f   :  { %525 = dma.vmem_to_hbm [thread:$0]  %s523_s26, 128, %s881_s11, [#allocation4]  }
 0x350   :  { %723 = dma.done.wait [#allocation4], 128  }
 0x351   :  { %724 = vsyncadd [#allocation4], 4294967168 }
 0x352   :  { %529 = vsyncpa [#allocation3], 1 }
 0x353   :  { %530 = vsyncpa [#allocation6], 1 }
 0x354   :  { %531 = vsyncpa [#allocation9], 1 }
 0x355   :  { %532 = vsyncpa [#allocation4], 1 }

</bundles_post_ra>
